<compile_context>
chip_gen: v7x
topology: tpu7x:2x2x1
jax: 0.10.0
libtpu: 0.0.40
codegen_flags: <defaults>
</compile_context>

<pallas_src>
import math

import jax
import jax.numpy as jnp
from jax.experimental import pallas as pl
from jax.experimental.pallas import tpu as pltpu

D_IN = 28 * 28        # 784 (not padded; full-dim BlockSpec handles the K tail)
H1 = 128
H2 = 64
N_OUT = 10
N_PAD = 128           # lane-aligned output columns (cols 10..127 are zero weights)


def _round_up(n, m):
    return ((n + m - 1) // m) * m


def _cdiv(a, b):
    return -(-a // b)


def mlp_kernel(x_ref, w1_ref, b1_ref, w2_ref, b2_ref, w3_ref, b3_ref, o_ref):
    # x arrives f32 straight from HBM; cast to bf16 in VMEM for the MXU.
    x = x_ref[...].astype(jnp.bfloat16)
    # fc1 + relu   (bf16 x bf16 -> f32 accumulate on the MXU)
    h1 = jnp.dot(x, w1_ref[...], preferred_element_type=jnp.float32)
    h1 = jnp.maximum(h1 + b1_ref[...], 0.0)
    # fc2 + relu
    h2 = jnp.dot(h1.astype(jnp.bfloat16), w2_ref[...],
                 preferred_element_type=jnp.float32)
    h2 = jnp.maximum(h2 + b2_ref[...], 0.0)
    # fc3 (no activation); output columns 10..127 are zero-padded weights/bias.
    out = jnp.dot(h2.astype(jnp.bfloat16), w3_ref[...],
                  preferred_element_type=jnp.float32) + b3_ref[...]
    o_ref[...] = out.astype(o_ref.dtype)


def prepare_params(params):
    """Cast weights to bf16 (biases stay f32); pad only the output dim to 128."""
    w1 = params["w1"].astype(jnp.bfloat16)                       # (784, 128)
    b1 = params["b1"].astype(jnp.float32)                        # (1, 128)
    w2 = params["w2"].astype(jnp.bfloat16)                       # (128, 64)
    b2 = params["b2"].astype(jnp.float32)                        # (1, 64)
    w3 = jnp.pad(params["w3"], ((0, 0), (0, N_PAD - N_OUT))).astype(jnp.bfloat16)
    b3 = jnp.pad(params["b3"], ((0, 0), (0, N_PAD - N_OUT))).astype(jnp.float32)
    return dict(w1=w1, b1=b1, w2=w2, b2=b2, w3=w3, b3=b3)


def _chip_config():
    """(max_batch_tile, want_two_core_split) per TPU generation.

    Tiles are sized so double-buffered f32 x + bf16 out + weights + intermediates
    stay under the default scoped-VMEM limit (16 MiB v5e, 32 MiB v6e/v7x).
    """
    try:
        kind = jax.devices()[0].device_kind.lower()
    except Exception:  # pragma: no cover - defensive fallback
        kind = ""
    if "v7" in kind:
        return 2048, True          # 64 MiB physical VMEM, 2 TensorCores/chip
    if "v6" in kind or "trillium" in kind:
        return 3072, False         # ~23 MiB footprint < 32 MiB scoped default
    if "v5" in kind:
        return 1024, False         # ~8 MiB footprint < 16 MiB scoped default
    return 1024, False


def _pick_batch_tile(B, max_tile, two_core):
    """Pick a tile so the last block is nearly full (no batch-padding blowup)."""
    n_steps = max(1, _cdiv(B, max_tile))
    if two_core and B >= 32:
        # >= 2 steps, even count, so both TensorCores get balanced work (v7x).
        n_steps = max(n_steps, 2)
        n_steps += n_steps % 2
    return _round_up(_cdiv(B, n_steps), 16)


def mlp_forward(x, prepared_params, *, batch_tile=None, vmem_limit_bytes=None,
                unpadded=True):
    """x: any shape with trailing elements 784 per row (mirrors x.view(-1, 784)).

    Returns (B, 10) bf16 logits when unpadded=True (module semantics); pass
    unpadded=False to get the raw (B_pad, 128) bf16 buffer and fuse the slice
    into the consumer.
    """
    x = x.reshape(-1, D_IN)
    B = x.shape[0]

    max_tile, two_core = _chip_config()
    if batch_tile is None:
        batch_tile = _pick_batch_tile(B, max_tile, two_core)
    batch_tile = _round_up(batch_tile, 16)
    B_pad = _round_up(B, batch_tile)
    grid = (B_pad // batch_tile,)

    if B_pad != B:
        x = jnp.pad(x, ((0, B_pad - B), (0, 0)))

    p = prepared_params
    w1, b1, w2, b2, w3, b3 = p["w1"], p["b1"], p["w2"], p["b2"], p["w3"], p["b3"]

    # Weights/biases are tiny (<0.25 MiB total): pass whole, constant index_map
    # (block is revisited, not re-DMA'd, across grid steps).
    def full(a):
        return pl.BlockSpec(a.shape, lambda i: (0,) * a.ndim)

    flops = 2 * B_pad * (D_IN * H1 + H1 * H2 + H2 * N_PAD)
    bytes_accessed = (B_pad * D_IN * 4            # x in, f32
                      + B_pad * N_PAD * 2         # out, bf16
                      + (D_IN * H1 + H1 * H2 + H2 * N_PAD) * 2   # bf16 weights
                      + (H1 + H2 + N_PAD) * 4)                   # f32 biases

    out = pl.pallas_call(
        mlp_kernel,
        out_shape=jax.ShapeDtypeStruct((B_pad, N_PAD), jnp.bfloat16),
        grid_spec=pltpu.PrefetchScalarGridSpec(
            num_scalar_prefetch=0,
            grid=grid,
            in_specs=[
                # Last dim 784 == full array dim -> legal despite not being a
                # multiple of 128; Mosaic masks the final K chunk.
                pl.BlockSpec((batch_tile, D_IN), lambda i: (i, 0)),
                full(w1), full(b1),
                full(w2), full(b2),
                full(w3), full(b3),
            ],
            out_specs=pl.BlockSpec((batch_tile, N_PAD), lambda i: (i, 0)),
        ),
        compiler_params=pltpu.CompilerParams(
            dimension_semantics=("parallel",),
            vmem_limit_bytes=vmem_limit_bytes,
        ),
        cost_estimate=pl.CostEstimate(
            flops=flops, transcendentals=0, bytes_accessed=bytes_accessed),
    )(x, w1, b1, w2, b2, w3, b3)

    if unpadded:
        return out[:B, :N_OUT]
    return out


def init_params(key):
    """Deterministic init mirroring nn.Linear's U(-1/sqrt(fan_in), 1/sqrt(fan_in))."""
    sizes = [(D_IN, H1), (H1, H2), (H2, N_OUT)]
    params = {}
    for idx, (fan_in, fan_out) in enumerate(sizes, start=1):
        key, kw, kb = jax.random.split(key, 3)
        bound = 1.0 / math.sqrt(fan_in)
        params[f"w{idx}"] = jax.random.uniform(
            kw, (fan_in, fan_out), jnp.float32, minval=-bound, maxval=bound)
        params[f"b{idx}"] = jax.random.uniform(
            kb, (1, fan_out), jnp.float32, minval=-bound, maxval=bound)
    return params


def reference_forward(x, params):
    x = x.reshape(-1, D_IN)
    h1 = jnp.maximum(x @ params["w1"] + params["b1"], 0.0)
    h2 = jnp.maximum(h1 @ params["w2"] + params["b2"], 0.0)
    return h2 @ params["w3"] + params["b3"]


if __name__ == "__main__":
    key = jax.random.PRNGKey(0)
    key, kx = jax.random.split(key)
    # Small MNIST-like batch; forward does x.view(-1, 784).
    x_img = jax.random.normal(kx, (8, 1, 28, 28), jnp.float32)

    params = init_params(key)
    prepared = prepare_params(params)

    out = mlp_forward(x_img, prepared)          # (8, 10) bf16 logits
    out = jax.block_until_ready(out)

    ref = reference_forward(x_img, params)
    assert out.shape == (8, 10)
    # bf16 matmul inputs + bf16 output (f32 accumulate) vs f32 reference.
    assert jnp.allclose(out.astype(jnp.float32), ref, atol=2e-2, rtol=2e-2)
    print("KERNEL_OK")
</pallas_src>

<mosaic_0001>
module attributes {stable_mosaic.version = 11 : i64} {
  func.func @mlp_kernel(%arg0: i32, %arg1: memref<16x784xf32, #tpu.memory_space<vmem>>, %arg2: memref<784x128xbf16, #tpu.memory_space<vmem>>, %arg3: memref<1x128xf32, #tpu.memory_space<vmem>>, %arg4: memref<128x64xbf16, #tpu.memory_space<vmem>>, %arg5: memref<1x64xf32, #tpu.memory_space<vmem>>, %arg6: memref<64x128xbf16, #tpu.memory_space<vmem>>, %arg7: memref<1x128xf32, #tpu.memory_space<vmem>>, %arg8: memref<16x128xbf16, #tpu.memory_space<vmem>>) attributes {dimension_semantics = [#tpu.dimension_semantics<parallel>], iteration_bounds = array<i64: 1>, scalar_prefetch = 0 : i64, scratch_operands = 0 : i64, tpu.core_type = #tpu.core_type<tc>, window_params = [{transform_indices = @transform_0, window_bounds = array<i64: 16, 784>}, {pipeline_mode = #tpu.pipeline_mode<synchronous>, transform_indices = @transform_1, window_bounds = array<i64: 784, 128>}, {pipeline_mode = #tpu.pipeline_mode<synchronous>, transform_indices = @transform_2, window_bounds = array<i64: 1, 128>}, {pipeline_mode = #tpu.pipeline_mode<synchronous>, transform_indices = @transform_3, window_bounds = array<i64: 128, 64>}, {pipeline_mode = #tpu.pipeline_mode<synchronous>, transform_indices = @transform_4, window_bounds = array<i64: 1, 64>}, {pipeline_mode = #tpu.pipeline_mode<synchronous>, transform_indices = @transform_5, window_bounds = array<i64: 64, 128>}, {pipeline_mode = #tpu.pipeline_mode<synchronous>, transform_indices = @transform_6, window_bounds = array<i64: 1, 128>}, {transform_indices = @transform_7, window_bounds = array<i64: 16, 128>}]} {
    %c0 = arith.constant 0 : index
    %c0_0 = arith.constant 0 : index
    %0 = vector.load %arg1[%c0, %c0_0] : memref<16x784xf32, #tpu.memory_space<vmem>>, vector<16x784xf32>
    %1 = arith.truncf %0 : vector<16x784xf32> to vector<16x784xbf16>
    %c0_1 = arith.constant 0 : index
    %c0_2 = arith.constant 0 : index
    %2 = vector.load %arg2[%c0_1, %c0_2] : memref<784x128xbf16, #tpu.memory_space<vmem>>, vector<784x128xbf16>
    %cst = arith.constant dense<0.000000e+00> : vector<16x128xf32>
    %3 = tpu.matmul %1, %2, %cst {dimension_numbers = #tpu.dot_dimension_numbers<[1], [0], [0], [1], [0, 0, 1, 1], [], []>} : vector<16x784xbf16>, vector<784x128xbf16>, vector<16x128xf32> -> vector<16x128xf32>
    %c0_3 = arith.constant 0 : index
    %c0_4 = arith.constant 0 : index
    %4 = vector.load %arg3[%c0_3, %c0_4] : memref<1x128xf32, #tpu.memory_space<vmem>>, vector<1x128xf32>
    %5 = vector.broadcast %4 : vector<1x128xf32> to vector<16x128xf32>
    %6 = arith.addf %3, %5 : vector<16x128xf32>
    %cst_5 = arith.constant 0.000000e+00 : f32
    %7 = vector.broadcast %cst_5 : f32 to vector<16x128xf32>
    %8 = arith.maximumf %6, %7 : vector<16x128xf32>
    %9 = arith.truncf %8 : vector<16x128xf32> to vector<16x128xbf16>
    %c0_6 = arith.constant 0 : index
    %c0_7 = arith.constant 0 : index
    %10 = vector.load %arg4[%c0_6, %c0_7] : memref<128x64xbf16, #tpu.memory_space<vmem>>, vector<128x64xbf16>
    %cst_8 = arith.constant dense<0.000000e+00> : vector<16x64xf32>
    %11 = tpu.matmul %9, %10, %cst_8 {dimension_numbers = #tpu.dot_dimension_numbers<[1], [0], [0], [1], [0, 0, 1, 1], [], []>} : vector<16x128xbf16>, vector<128x64xbf16>, vector<16x64xf32> -> vector<16x64xf32>
    %c0_9 = arith.constant 0 : index
    %c0_10 = arith.constant 0 : index
    %12 = vector.load %arg5[%c0_9, %c0_10] : memref<1x64xf32, #tpu.memory_space<vmem>>, vector<1x64xf32>
    %13 = vector.broadcast %12 : vector<1x64xf32> to vector<16x64xf32>
    %14 = arith.addf %11, %13 : vector<16x64xf32>
    %cst_11 = arith.constant 0.000000e+00 : f32
    %15 = vector.broadcast %cst_11 : f32 to vector<16x64xf32>
    %16 = arith.maximumf %14, %15 : vector<16x64xf32>
    %17 = arith.truncf %16 : vector<16x64xf32> to vector<16x64xbf16>
    %c0_12 = arith.constant 0 : index
    %c0_13 = arith.constant 0 : index
    %18 = vector.load %arg6[%c0_12, %c0_13] : memref<64x128xbf16, #tpu.memory_space<vmem>>, vector<64x128xbf16>
    %cst_14 = arith.constant dense<0.000000e+00> : vector<16x128xf32>
    %19 = tpu.matmul %17, %18, %cst_14 {dimension_numbers = #tpu.dot_dimension_numbers<[1], [0], [0], [1], [0, 0, 1, 1], [], []>} : vector<16x64xbf16>, vector<64x128xbf16>, vector<16x128xf32> -> vector<16x128xf32>
    %c0_15 = arith.constant 0 : index
    %c0_16 = arith.constant 0 : index
    %20 = vector.load %arg7[%c0_15, %c0_16] : memref<1x128xf32, #tpu.memory_space<vmem>>, vector<1x128xf32>
    %21 = vector.broadcast %20 : vector<1x128xf32> to vector<16x128xf32>
    %22 = arith.addf %19, %21 : vector<16x128xf32>
    %23 = arith.truncf %22 : vector<16x128xf32> to vector<16x128xbf16>
    %c0_17 = arith.constant 0 : index
    %c0_18 = arith.constant 0 : index
    %24 = vector.load %arg8[%c0_17, %c0_18] : memref<16x128xbf16, #tpu.memory_space<vmem>>, vector<16x128xbf16>
    tpu.vector_store %arg8[%c0_17, %c0_18], %23 {strides = array<i32>} : memref<16x128xbf16, #tpu.memory_space<vmem>>, vector<16x128xbf16>,
    return
  }
  func.func @transform_0(%arg0: i32) -> (i32, i32) {
    %c0_i32 = arith.constant 0 : i32
    %c0_i32_0 = arith.constant 0 : i32
    return %arg0, %c0_i32 : i32, i32
  }
  func.func @transform_1(%arg0: i32) -> (i32, i32) {
    %c0_i32 = arith.constant 0 : i32
    %c0_i32_0 = arith.constant 0 : i32
    %c0_i32_1 = arith.constant 0 : i32
    return %c0_i32, %c0_i32_0 : i32, i32
  }
  func.func @transform_2(%arg0: i32) -> (i32, i32) {
    %c0_i32 = arith.constant 0 : i32
    %c0_i32_0 = arith.constant 0 : i32
    %c0_i32_1 = arith.constant 0 : i32
    return %c0_i32, %c0_i32_0 : i32, i32
  }
  func.func @transform_3(%arg0: i32) -> (i32, i32) {
    %c0_i32 = arith.constant 0 : i32
    %c0_i32_0 = arith.constant 0 : i32
    %c0_i32_1 = arith.constant 0 : i32
    return %c0_i32, %c0_i32_0 : i32, i32
  }
  func.func @transform_4(%arg0: i32) -> (i32, i32) {
    %c0_i32 = arith.constant 0 : i32
    %c0_i32_0 = arith.constant 0 : i32
    %c0_i32_1 = arith.constant 0 : i32
    return %c0_i32, %c0_i32_0 : i32, i32
  }
  func.func @transform_5(%arg0: i32) -> (i32, i32) {
    %c0_i32 = arith.constant 0 : i32
    %c0_i32_0 = arith.constant 0 : i32
    %c0_i32_1 = arith.constant 0 : i32
    return %c0_i32, %c0_i32_0 : i32, i32
  }
  func.func @transform_6(%arg0: i32) -> (i32, i32) {
    %c0_i32 = arith.constant 0 : i32
    %c0_i32_0 = arith.constant 0 : i32
    %c0_i32_1 = arith.constant 0 : i32
    return %c0_i32, %c0_i32_0 : i32, i32
  }
  func.func @transform_7(%arg0: i32) -> (i32, i32) {
    %c0_i32 = arith.constant 0 : i32
    %c0_i32_0 = arith.constant 0 : i32
    return %arg0, %c0_i32 : i32, i32
  }
}

</mosaic_0001>

<bundles_post_ra>
// kernel: tpu_custom_call.1
= control target key start
LH: loop header
LB: loop body
LE: loop exit
PB: predicated region body
PF: predicated region fallthrough
CT: control target
= control target key end

     0   :  { %12 = vsyncpa [#allocation3], 0  ;;  %s1366_s0 = inlined_call_operand.hbm [shape: f32[16,784], index: 0, kind: input, shape index: {}]   ;;  %s1367_s1 = inlined_call_operand.hbm [shape: bf16[784,128], index: 1, kind: input, shape index: {}]   ;;  %s1368_s2 = inlined_call_operand.vmem [shape: f32[1,128], index: 2, kind: input, shape index: {}]   ;;  %s1369_s3 = inlined_call_operand.vmem [shape: bf16[128,64], index: 3, kind: input, shape index: {}]   ;;  %s1370_s4 = inlined_call_operand.vmem [shape: f32[1,64], index: 4, kind: input, shape index: {}]   ;;  %s1371_s5 = inlined_call_operand.vmem [shape: bf16[64,128], index: 5, kind: input, shape index: {}]   ;;  %s1372_s6 = inlined_call_operand.vmem [shape: f32[1,128], index: 6, kind: input, shape index: {}]   ;;  %s1373_s7 = inlined_call_operand.hbm [shape: bf16[16,128], index: 7, kind: output, shape index: {}]  }
   0x1   :  { %13 = vsyncpa [#allocation6], 0 }
   0x2   :  { %14 = vsyncpa [#allocation4], 0  ;;  %s1211_s24 = smov [#allocation2]   ;;  %s1139_s28 = scalar_lea.hbm %s1366_s0, 1792 }
   0x3   :  { %s20_s25 = sshll.u32 %s1211_s24, 4  ;;  %p1140_p0 = scmp.ne.s32.totalorder %s1366_s0, %s1139_s28  ;;  %s21_s25 = int_to_ptr.vmem [resolvable:$true] %s20_s25 }
   0x4   :  { %p1143_p1 = scmp.lt.u32.totalorder %s1139_s28, %s1366_s0 }
   0x6   :  { %p1145_p2 = pnand %p1143_p1, %p1140_p0 }
   0x8   :  { %1148 = shalt.err (!%p1145_p2)
}
   0x9   :  { %s1149_s10 = scalar_lea.vmem %s21_s25, 1792  ;;  %p1154_p4 = scmp.lt.s32.totalorder %s21_s25, %s21_s25 }
   0xa   :  { %p1150_p3 = scmp.ne.s32.totalorder %s21_s25, %s1149_s10  ;;  %p1155_p5 = scmp.lt.s32.totalorder %s1149_s10, %s1149_s10 }
   0xc   :  { %p1156_p6 = por %p1155_p5, %p1154_p4 }
   0xe   :  { %p1157_p7 = pnand %p1156_p6, %p1150_p3 }
  0x10   :  { %1160 = shalt.err (!%p1157_p7)
}
  0x11   :  { %s1212_s11 = smov 896   ;;  %s1213_s12 = smov 56  }
  0x12   :  { %26 = dma.hbm_to_vmem [thread:$0]  %s1366_s0, 1792, %s21_s25, [#allocation3], %s1212_s11, %s1212_s11, %s1213_s12  }
  0x13   :  { %s1214_s15 = smov [#allocation5]   ;;  %s1161_s19 = scalar_lea.hbm %s1367_s1, 6272 }
  0x14   :  { %s32_s16 = sshll.u32 %s1214_s15, 4  ;;  %p1162_p8 = scmp.ne.s32.totalorder %s1367_s1, %s1161_s19  ;;  %s33_s16 = int_to_ptr.vmem [resolvable:$true] %s32_s16 }
  0x15   :  { %p1165_p9 = scmp.lt.u32.totalorder %s1161_s19, %s1367_s1 }
  0x17   :  { %p1167_p10 = pnand %p1165_p9, %p1162_p8 }
  0x19   :  { %1170 = shalt.err (!%p1167_p10)
}
  0x1a   :  { %s1171_s24 = scalar_lea.vmem %s33_s16, 6272  ;;  %p1176_p12 = scmp.lt.s32.totalorder %s33_s16, %s33_s16 }
  0x1b   :  { %p1172_p11 = scmp.ne.s32.totalorder %s33_s16, %s1171_s24  ;;  %p1177_p13 = scmp.lt.s32.totalorder %s1171_s24, %s1171_s24 }
  0x1d   :  { %p1178_p0 = por %p1177_p13, %p1176_p12 }
  0x1f   :  { %p1179_p1 = pnand %p1178_p0, %p1172_p11 }
  0x21   :  { %1182 = shalt.err (!%p1179_p1)
}
  0x22   :  { %s1215_s0 = smov 64   ;;  %s1216_s25 = smov 4  }
  0x23   :  { %38 = dma.hbm_to_vmem [thread:$0]  %s1367_s1, 6272, %s33_s16, [#allocation6], %s1215_s0, %s1215_s0, %s1216_s25  }
  0x24   :  { %1205 = dma.done.wait [#allocation3], 1792  }
  0x25   :  { %1206 = vsyncadd [#allocation3], 4294965504 }
  0x26   :  { %1207 = dma.done.wait [#allocation6], 6272  }
  0x27   :  { %1208 = vsyncadd [#allocation6], 4294961024  ;;  %v1078_v0 = vld [vmem:[#allocation5 + $0x40] sm:$0xff]   ;;  %v1082_v4 = vld [vmem:[#allocation5 + $0x48] sm:$0xff]   ;;  %v1217_v43 = vmov 0.0   ;;  %vm1218_vm0 = vmmov 0  }
  0x28   :  { %v1079_v1 = vld [vmem:[#allocation5] sm:$0xff]   ;;  %949 = vmatprep.subr.bf16.mxu0 %v1078_v0  ;;  %v1083_v5 = vld [vmem:[#allocation5 + $0x8] sm:$0xff]   ;;  %v1086_v8 = vld [vmem:[#allocation5 + $0x50] sm:$0xff]   ;;  %vm476_vm1 = vcmask 130048   ;;  %vm801_vm2 = vcmask 523264  }
  0x29   :  { %v1080_v2 = vld [vmem:[#allocation5 + $0xc0] sm:$0xff]   ;;  %950 = vmatpush3.bf16.msra.mxu0 %v1079_v1  ;;  %v1084_v6 = vld [vmem:[#allocation5 + $0xc8] sm:$0xff]   ;;  %v1087_v9 = vld [vmem:[#allocation5 + $0x10] sm:$0xff]  }
  0x2a   :  { %v1081_v3 = vld [vmem:[#allocation5 + $0x80] sm:$0xff]   ;;  %971 = vmatprep.subr.bf16.mxu1 %v1080_v2  ;;  %951 = vmatprep.subr.bf16.mxu0 %v1082_v4  ;;  %v1085_v7 = vld [vmem:[#allocation5 + $0x88] sm:$0xff]   ;;  %v1088_v10 = vld [vmem:[#allocation5 + $0xd0] sm:$0xff]  }
  0x2b   :  { %972 = vmatpush3.bf16.msra.mxu1 %v1081_v3  ;;  %v1089_v11 = vld [vmem:[#allocation5 + $0x90] sm:$0xff]   ;;  %v1090_v12 = vld [vmem:[#allocation5 + $0x58] sm:$0xff]   ;;  %v1094_v16 = vld [vmem:[#allocation5 + $0x60] sm:$0xff]  }
  0x2c   :  { %973 = vmatprep.subr.bf16.mxu1 %v1084_v6  ;;  %v1091_v13 = vld [vmem:[#allocation5 + $0x18] sm:$0xff]   ;;  %v1095_v17 = vld [vmem:[#allocation5 + $0x20] sm:$0xff]   ;;  %v1098_v20 = vld [vmem:[#allocation5 + $0x68] sm:$0xff]  }
  0x2d   :  { %952 = vmatpush3.bf16.msra.mxu0 %v1083_v5  ;;  %v1092_v14 = vld [vmem:[#allocation5 + $0xd8] sm:$0xff]   ;;  %v1096_v18 = vld [vmem:[#allocation5 + $0xe0] sm:$0xff]   ;;  %v1099_v21 = vld [vmem:[#allocation5 + $0x28] sm:$0xff]  }
  0x2e   :  { %953 = vmatprep.subr.bf16.mxu0 %v1086_v8  ;;  %v1093_v15 = vld [vmem:[#allocation5 + $0x98] sm:$0xff]   ;;  %v1097_v19 = vld [vmem:[#allocation5 + $0xa0] sm:$0xff]   ;;  %v1100_v22 = vld [vmem:[#allocation5 + $0xe8] sm:$0xff]  }
  0x2f   :  { %974 = vmatpush3.bf16.msra.mxu1 %v1085_v7  ;;  %v1101_v23 = vld [vmem:[#allocation5 + $0xa8] sm:$0xff]   ;;  %v1102_v24 = vld [vmem:[#allocation5 + $0x70] sm:$0xff]   ;;  %v1106_v28 = vld [vmem:[#allocation5 + $0x78] sm:$0xff]  }
  0x30   :  { %975 = vmatprep.subr.bf16.mxu1 %v1088_v10  ;;  %v1103_v25 = vld [vmem:[#allocation5 + $0x30] sm:$0xff]   ;;  %v1107_v29 = vld [vmem:[#allocation5 + $0x38] sm:$0xff]   ;;  %v63_v36 = vld [vmem:[#allocation2 + $0x38] sm:$0xff] }
  0x31   :  { %954 = vmatpush3.bf16.msra.mxu0 %v1087_v9  ;;  %v1104_v26 = vld [vmem:[#allocation5 + $0xf0] sm:$0xff]   ;;  %v1108_v30 = vld [vmem:[#allocation5 + $0xf8] sm:$0xff]   ;;  %v1110_v38 = vld [vmem:[#allocation5 + $0x140] sm:$0xff]  }
  0x32   :  { %955 = vmatprep.subr.bf16.mxu0 %v1090_v12  ;;  %v1105_v27 = vld [vmem:[#allocation5 + $0xb0] sm:$0xff]   ;;  %v57_v31 = vld [vmem:[#allocation2 + $0x8] sm:$0xff]  ;;  %v59_v39 = vld [vmem:[#allocation2 + $0x18] sm:$0xff] }
  0x33   :  { %976 = vmatpush3.bf16.msra.mxu1 %v1089_v11  ;;  %v64_v32 = vld [vmem:[#allocation2 + $0x40] sm:$0xff]  ;;  %v1109_v34 = vld [vmem:[#allocation5 + $0xb8] sm:$0xff]   ;;  %v66_v40 = vld [vmem:[#allocation2 + $0x50] sm:$0xff] }
  0x34   :  { %977 = vmatprep.subr.bf16.mxu1 %v1092_v14  ;;  %v71_v33 = vpack.c.bf16 %v64_v32, %v57_v31  ;;  %v56_v35 = vld [vmem:[#allocation2] sm:$0xff]  ;;  %v73_v41 = vpack.c.bf16 %v66_v40, %v59_v39  ;;  %v1111_v42 = vld [vmem:[#allocation5 + $0x100] sm:$0xff]   ;;  %v65_v45 = vld [vmem:[#allocation2 + $0x48] sm:$0xff] }
  0x35   :  { %956 = vmatpush3.bf16.msra.mxu0 %v1091_v13  ;;  %v70_v37 = vpack.c.bf16 %v63_v36, %v56_v35  ;;  %v58_v44 = vld [vmem:[#allocation2 + $0x10] sm:$0xff]  ;;  %v1112_v47 = vld [vmem:[#allocation5 + $0x148] sm:$0xff]   ;;  %v1114_v49 = vld [vmem:[#allocation5 + $0x150] sm:$0xff]  }
  0x36   :  { %957 = vmatprep.subr.bf16.mxu0 %v1094_v16  ;;  %512 = vmatprep.mubr.bf16.mxu0 %v71_v33  ;;  %v72_v46 = vpack.c.bf16 %v65_v45, %v58_v44  ;;  %v1113_v48 = vld [vmem:[#allocation5 + $0x108] sm:$0xff]   ;;  %v1115_v50 = vld [vmem:[#allocation5 + $0x110] sm:$0xff]   ;;  %v1116_v51 = vld [vmem:[#allocation5 + $0x158] sm:$0xff]  }
  0x37   :  { %978 = vmatpush3.bf16.msra.mxu1 %v1093_v15  ;;  %553 = vmatprep.mubr.bf16.mxu1 %v73_v41  ;;  %v1117_v52 = vld [vmem:[#allocation5 + $0x118] sm:$0xff]   ;;  %v1118_v53 = vld [vmem:[#allocation5 + $0x160] sm:$0xff]   ;;  %v1120_v55 = vld [vmem:[#allocation5 + $0x168] sm:$0xff]  }
  0x38   :  { %979 = vmatprep.subr.bf16.mxu1 %v1096_v18  ;;  %v1119_v54 = vld [vmem:[#allocation5 + $0x120] sm:$0xff]   ;;  %v61_v57 = vld [vmem:[#allocation2 + $0x28] sm:$0xff]  ;;  %v1121_v58 = vld [vmem:[#allocation5 + $0x128] sm:$0xff]  }
  0x39   :  { %958 = vmatpush3.bf16.msra.mxu0 %v1095_v17  ;;  %v1126_v56 = vld [vmem:[#allocation5 + $0x180] sm:$0xff]   ;;  %v1122_v59 = vld [vmem:[#allocation5 + $0x170] sm:$0xff]   ;;  %v69_v63 = vld [vmem:[#allocation2 + $0x68] sm:$0xff] }
  0x3a   :  { %959 = vmatprep.subr.bf16.mxu0 %v1098_v20  ;;  %v68_v60 = vld [vmem:[#allocation2 + $0x60] sm:$0xff]  ;;  %v62_v62 = vld [vmem:[#allocation2 + $0x30] sm:$0xff]  ;;  %v1124_v2 = vld [vmem:[#allocation5 + $0x178] sm:$0xff]  }
  0x3b   :  { %980 = vmatpush3.bf16.msra.mxu1 %v1097_v19  ;;  %v75_v61 = vpack.c.bf16 %v68_v60, %v61_v57  ;;  %v76_v0 = vpack.c.bf16 %v69_v63, %v62_v62  ;;  %v1123_v1 = vld [vmem:[#allocation5 + $0x130] sm:$0xff]   ;;  %v1125_v3 = vld [vmem:[#allocation5 + $0x138] sm:$0xff]   ;;  %v67_v5 = vld [vmem:[#allocation2 + $0x58] sm:$0xff] }
  0x3c   :  { %981 = vmatprep.subr.bf16.mxu1 %v1100_v22  ;;  %v60_v4 = vld [vmem:[#allocation2 + $0x20] sm:$0xff]  ;;  %v1128_v8 = vld [vmem:[%s1369_s3 + $0x8] sm:$0xff]   ;;  %v1129_v9 = vld [vmem:[%s1369_s3 + $0x10] sm:$0xff]  }
  0x3d   :  { %960 = vmatpush3.bf16.msra.mxu0 %v1099_v21  ;;  %v74_v6 = vpack.c.bf16 %v67_v5, %v60_v4  ;;  %v1127_v7 = vld [vmem:[%s1369_s3] sm:$0xff]   ;;  %v1130_v10 = vld [vmem:[%s1369_s3 + $0x18] sm:$0xff]   ;;  %v1132_v12 = vld [vmem:[%s1369_s3 + $0x28] sm:$0xff]  }
  0x3e   :  { %961 = vmatprep.subr.bf16.mxu0 %v1102_v24  ;;  %v1131_v11 = vld [vmem:[%s1369_s3 + $0x20] sm:$0xff]   ;;  %v1133_v13 = vld [vmem:[%s1369_s3 + $0x30] sm:$0xff]   ;;  %v1134_v14 = vld [vmem:[%s1369_s3 + $0x38] sm:$0xff]  }
  0x3f   :  { %982 = vmatpush3.bf16.msra.mxu1 %v1101_v23  ;;  %v1135_v15 = vld [vmem:[%s1371_s5] sm:$0xff]   ;;  %v1136_v16 = vld [vmem:[%s1371_s5 + $0x8] sm:$0xff]  }
  0x40   :  { %983 = vmatprep.subr.bf16.mxu1 %v1104_v26  ;;  %v874_v18 = vld [vmem:[%s1368_s2] ss:$0 sm:$0xff] }
  0x41   :  { %962 = vmatpush3.bf16.msra.mxu0 %v1103_v25 }
  0x42   :  { %963 = vmatprep.subr.bf16.mxu0 %v1106_v28 }
  0x43   :  { %984 = vmatpush3.bf16.msra.mxu1 %v1105_v27 }
  0x44   :  { %985 = vmatprep.subr.bf16.mxu1 %v1108_v30 }
  0x45   :  { %964 = vmatpush3.bf16.msra.mxu0 %v1107_v29 }
  0x46   :  { %993 = vmatprep.subr.bf16.mxu0 %v1110_v38 }
  0x47   :  { %986 = vmatpush3.bf16.msra.mxu1 %v1109_v34 }
  0x48   :  { %1031 = vmatprep.subr.bf16.mxu1 %v1217_v43  ;;  %513 = vmatmul.mubr.bf16.vlgmr.msra.gmra.mrb[0].mxu0 %v70_v37 }
  0x49   :  { %994 = vmatpush3.bf16.msra.mxu0 %v1111_v42  ;;  %594 = vmatprep.mubr.bf16.mxu0 %v75_v61 }
  0x4a   :  { %554 = vmatmul.mubr.bf16.vlgmr.msra.gmra.mrb[0].mxu1 %v72_v46  ;;  %995 = vmatprep.subr.bf16.mxu0 %v1112_v47 }
  0x4b   :  { %1033 = vmatprep.mubr.msk.bf16.mxu1 %vm1218_vm0, %v1217_v43  ;;  %1032 = vmatpush3.bf16.msra.mxu1 %v1126_v56 }
  0x4c   :  { %1037 = vmatprep.subr.bf16.mxu1 %v1217_v43 }
  0x4d   :  { %996 = vmatpush3.bf16.msra.mxu0 %v1113_v48 }
  0x4e   :  { %997 = vmatprep.subr.bf16.mxu0 %v1114_v49 }
  0x51   :  { %998 = vmatpush3.bf16.msra.mxu0 %v1115_v50 }
  0x52   :  { %999 = vmatprep.subr.bf16.mxu0 %v1116_v51  ;;  %1034 = vmatmul.mubr.msk.bf16.vlgmr.msra.gmra.mrb[4].mxu1 %vm476_vm1, %v76_v0 }
  0x53   :  { %1053 = vmatprep.mubr.msk.bf16.mxu1 %vm1218_vm0, %v1217_v43  ;;  %1038 = vmatpush3.bf16.msra.mxu1 %v1127_v7 }
  0x54   :  { %1039 = vmatprep.subr.bf16.mxu1 %v1217_v43 }
  0x55   :  { %1000 = vmatpush3.bf16.msra.mxu0 %v1117_v52  ;;  %v1137_v52 = vld [vmem:[%s1371_s5 + $0x10] sm:$0xff]  }
  0x56   :  { %1001 = vmatprep.subr.bf16.mxu0 %v1118_v53  ;;  %v1138_v53 = vld [vmem:[%s1371_s5 + $0x18] sm:$0xff]   ;;  %s1219_s5 = smov [#allocation7]  }
  0x57   :  { %1040 = vmatpush3.bf16.msra.mxu1 %v1128_v8 }
  0x58   :  { %1041 = vmatprep.subr.bf16.mxu1 %v1217_v43 }
  0x59   :  { %1002 = vmatpush3.bf16.msra.mxu0 %v1119_v54  ;;  %v925_v54 = vld [vmem:[%s1370_s4] ss:$0 sm:$0xff]  ;;  %s861_s4 = sshll.u32 %s1219_s5, 4  ;;  %s862_s4 = int_to_ptr.vmem [resolvable:$true] %s861_s4 }
  0x5a   :  { %1003 = vmatprep.subr.bf16.mxu0 %v1120_v55  ;;  %s1183_s9 = scalar_lea.vmem %s862_s4, 128  ;;  %p1188_p3 = scmp.lt.s32.totalorder %s862_s4, %s862_s4 }
  0x5b   :  { %1042 = vmatpush3.bf16.msra.mxu1 %v1129_v9  ;;  %p1184_p2 = scmp.ne.s32.totalorder %s862_s4, %s1183_s9  ;;  %p1189_p4 = scmp.lt.s32.totalorder %s1183_s9, %s1183_s9 }
  0x5c   :  { %1043 = vmatprep.subr.bf16.mxu1 %v1217_v43 }
  0x5d   :  { %1004 = vmatpush3.bf16.msra.mxu0 %v1121_v58  ;;  %p1190_p5 = por %p1189_p4, %p1188_p3 }
  0x5e   :  { %1005 = vmatprep.subr.bf16.mxu0 %v1122_v59 }
  0x5f   :  { %1044 = vmatpush3.bf16.msra.mxu1 %v1130_v10  ;;  %p1191_p6 = pnand %p1190_p5, %p1184_p2 }
  0x60   :  { %1045 = vmatprep.subr.bf16.mxu1 %v1217_v43 }
  0x61   :  { %1006 = vmatpush3.bf16.msra.mxu0 %v1123_v1 }
  0x62   :  { %1007 = vmatprep.subr.bf16.mxu0 %v1124_v2 }
  0x63   :  { %1046 = vmatpush3.bf16.msra.mxu1 %v1131_v11 }
  0x64   :  { %1047 = vmatprep.subr.bf16.mxu1 %v1217_v43 }
  0x65   :  { %1008 = vmatpush3.bf16.msra.mxu0 %v1125_v3 }
  0x66   :  { %1057 = vmatprep.subr.bf16.mxu0 %v1217_v43 }
  0x67   :  { %1048 = vmatpush3.bf16.msra.mxu1 %v1132_v12 }
  0x68   :  { %595 = vmatmul.mubr.bf16.vlgmr.msra.gmra.mrb[4].mxu0 %v74_v6  ;;  %1049 = vmatprep.subr.bf16.mxu1 %v1217_v43 }
  0x69   :  { %1065 = vmatprep.mubr.msk.bf16.mxu0 %vm1218_vm0, %v1217_v43  ;;  %1058 = vmatpush3.bf16.msra.mxu0 %v1135_v15 }
  0x6a   :  { %1059 = vmatprep.subr.bf16.mxu0 %v1217_v43 }
  0x6b   :  { %1050 = vmatpush3.bf16.msra.mxu1 %v1133_v13 }
  0x6c   :  { %1051 = vmatprep.subr.bf16.mxu1 %v1217_v43 }
  0x6d   :  { %1060 = vmatpush3.bf16.msra.mxu0 %v1136_v16 }
  0x6e   :  { %1061 = vmatprep.subr.bf16.mxu0 %v1217_v43 }
  0x6f   :  { %1052 = vmatpush3.bf16.msra.mxu1 %v1134_v14 }
  0x71   :  { %1062 = vmatpush3.bf16.msra.mxu0 %v1137_v52 }
  0x72   :  { %1063 = vmatprep.subr.bf16.mxu0 %v1217_v43  ;;  %v934_v43 = vld [vmem:[%s1372_s6] ss:$0 sm:$0xff] }
  0x75   :  { %1064 = vmatpush3.bf16.msra.mxu0 %v1138_v53 }
 0x11b   :  { %v965_v17 = vpop.f32.mrb[0].mxu0 }
 0x11c   :  { %v966_v19 = vpop.f32.mrb[1].mxu0 }
 0x11d   :  { %v967_v20 = vadd.f32 %v966_v19, %v965_v17  ;;  %v968_v21 = vpop.f32.mrb[2].mxu0  ;;  %v987_v22 = vpop.f32.mrb[0].mxu1 }
 0x11e   :  { %v969_v23 = vpop.f32.mrb[3].mxu0  ;;  %v988_v26 = vpop.f32.mrb[1].mxu1 }
 0x11f   :  { %v515_v24 = vadd.f32 %v967_v20, %v874_v18  ;;  %v970_v25 = vadd.f32 %v969_v23, %v968_v21  ;;  %v989_v27 = vadd.f32 %v988_v26, %v987_v22  ;;  %v990_v28 = vpop.f32.mrb[2].mxu1 }
 0x120   :  { %v991_v30 = vpop.f32.mrb[3].mxu1 }
 0x121   :  { %v518_v29 = vadd.f32 %v970_v25, %v874_v18  ;;  %v556_v31 = vadd.f32 %v989_v27, %v515_v24  ;;  %v992_v32 = vadd.f32 %v991_v30, %v990_v28 }
 0x123   :  { %v559_v33 = vadd.f32 %v992_v32, %v518_v29 }
 0x125   :  { %v637_v34 = vpop.f32.mrb[4].mxu1 }
 0x126   :  { %v1035_v35 = vpop.f32.mrb[5].mxu1 }
 0x127   :  { %v640_v36 = vpop.f32.mrb[6].mxu1 }
 0x128   :  { %v1036_v37 = vpop.f32.mrb[7].mxu1 }
 0x13b   :  { %v1009_v38 = vpop.f32.mrb[4].mxu0 }
 0x13c   :  { %v1010_v39 = vpop.f32.mrb[5].mxu0 }
 0x13d   :  { %v1011_v40 = vadd.f32 %v1010_v39, %v1009_v38  ;;  %v1012_v41 = vpop.f32.mrb[6].mxu0 }
 0x13e   :  { %v1013_v42 = vpop.f32.mrb[7].mxu0 }
 0x13f   :  { %v597_v44 = vadd.f32 %v1011_v40, %v556_v31  ;;  %v1014_v45 = vadd.f32 %v1013_v42, %v1012_v41 }
 0x141   :  { %v638_v46 = vadd.f32 %v637_v34, %v597_v44  ;;  %v600_v47 = vadd.f32 %v1014_v45, %v559_v33 }
 0x143   :  { %v641_v48 = vadd.f32 %v640_v36, %v600_v47  ;;  %v644_v49 = vmax.f32 %v638_v46, 0.0 }
 0x145   :  { %v645_v50 = vmax.f32 %v641_v48, 0.0 }
 0x147   :  { %v646_v51 = vpack.c.bf16 %v645_v50, %v644_v49 }
 0x149   :  { %1054 = vmatmul.mubr.bf16.vlgmr.msra.gmra.mrb[8].mxu1 %v646_v51 }
 0x21c   :  { %v752_v55 = vpop.f32.mrb[8].mxu1 }
 0x21d   :  { %v753_v56 = vadd.f32 %v925_v54, %v752_v55  ;;  %v1055_v57 = vpop.f32.mrb[9].mxu1 }
 0x21e   :  { %v755_v58 = vpop.f32.mrb[10].mxu1 }
 0x21f   :  { %v756_v59 = vadd.f32 %v925_v54, %v755_v58  ;;  %v1056_v60 = vpop.f32.mrb[11].mxu1  ;;  %v759_v61 = vmax.f32 %v753_v56, 0.0 }
 0x221   :  { %v760_v62 = vmax.f32 %v756_v59, 0.0 }
 0x223   :  { %v761_v63 = vpack.c.bf16 %v760_v62, %v759_v61 }
 0x225   :  { %1066 = vmatmul.mubr.msk.bf16.vlgmr.msra.gmra.mrb[8].mxu0 %vm801_vm2, %v761_v63 }
 0x2f8   :  { %v839_v0 = vpop.f32.mrb[8].mxu0 }
 0x2f9   :  { %v1067_v1 = vpop.f32.mrb[9].mxu0  ;;  %v840_v3 = vadd.f32 %v934_v43, %v839_v0 }
 0x2fa   :  { %v842_v2 = vpop.f32.mrb[10].mxu0 }
 0x2fb   :  { %v843_v4 = vadd.f32 %v934_v43, %v842_v2  ;;  %v1068_v5 = vpop.f32.mrb[11].mxu0 }
 0x2fd   :  { %v947_v6 = vpack.c.bf16 %v843_v4, %v840_v3 }
 0x2ff   :  { %948 = vst [vmem:[#allocation7] sm:$0xff] %v947_v6  }
 0x300   :  { %1194 = shalt.err (!%p1191_p6)
}
 0x301   :  { %s1195_s11 = scalar_lea.hbm %s1373_s7, 128 }
 0x302   :  { %p1196_p7 = scmp.ne.s32.totalorder %s1373_s7, %s1195_s11  ;;  %p1199_p8 = scmp.lt.u32.totalorder %s1195_s11, %s1373_s7 }
 0x304   :  { %p1201_p9 = pnand %p1199_p8, %p1196_p7 }
 0x306   :  { %1204 = shalt.err (!%p1201_p9)
}
 0x307   :  { %867 = dma.vmem_to_hbm [thread:$0]  %s862_s4, 128, %s1373_s7, [#allocation4], %s1215_s0, %s1215_s0, %s1216_s25  }
 0x308   :  { %1209 = dma.done.wait [#allocation4], 128  }
 0x309   :  { %1210 = vsyncadd [#allocation4], 4294967168 }
 0x30a   :  { %871 = vsyncpa [#allocation3], 1 }
 0x30b   :  { %872 = vsyncpa [#allocation6], 1 }
 0x30c   :  { %873 = vsyncpa [#allocation4], 1 }

</bundles_post_ra>
